<compile_context>
chip_gen: v7x
topology: tpu7x:2x2x1
jax: 0.10.0
libtpu: 0.0.40
codegen_flags: <defaults>
</compile_context>

<pallas_src>
import functools
from typing import NamedTuple

import jax
import jax.numpy as jnp
from jax import lax
from jax.experimental import pallas as pl
from jax.experimental.pallas import tpu as pltpu

LANE = 128


def _round_up(x, m):
    return ((x + m - 1) // m) * m


# --------------------------------------------------------------------------- #
# Kernel
# --------------------------------------------------------------------------- #
def _mlp_kernel(n_stack, has_hidden,
                x_ref, w0_ref, b0_ref, w_h_ref, b_h_ref, w_out_ref, b_out_ref,
                out_ref):
    """One batch-tile of the full MLP forward.

    x_ref    : [TB, Dp_in]        compute_dtype activations (lane-padded)
    w0_ref   : [Dp_in, Np]        first hidden weight   (compute_dtype)
    b0_ref   : [1, Np]            first hidden bias     (f32)
    w_h_ref  : [L-1, Np, Np]      stacked square hidden weights (compute_dtype)
    b_h_ref  : [L-1, 1, Np]       stacked square hidden biases  (f32)
    w_out_ref: [Kp, Dp_out]       final weight (compute_dtype)
    b_out_ref: [1, Dp_out]        final bias   (f32)
    out_ref  : [TB, Dp_out]
    """
    x = x_ref[...]                                   # already compute_dtype

    if has_hidden:
        # First (possibly non-square) hidden layer: Dp_in -> Np.
        z0 = jnp.dot(x, w0_ref[...],
                     preferred_element_type=jnp.float32) + b0_ref[...]
        h = jnp.tanh(z0)                             # f32 EUP tanh

        def hidden_layer(i, h):
            z = jnp.dot(h.astype(w_h_ref.dtype), w_h_ref[i],
                        preferred_element_type=jnp.float32) + b_h_ref[i]
            return jnp.tanh(z)

        if n_stack > 0:
            h = lax.fori_loop(0, n_stack, hidden_layer, h, unroll=True)
        h = h.astype(w_out_ref.dtype)
    else:
        h = x                                        # N_layers == 0 degenerate case

    y = jnp.dot(h, w_out_ref[...],
                preferred_element_type=jnp.float32) + b_out_ref[...]
    out_ref[...] = y.astype(out_ref.dtype)


# --------------------------------------------------------------------------- #
# One-time parameter preparation (padding / stacking / casting)
# --------------------------------------------------------------------------- #
class PreparedParams(NamedTuple):
    w0: jax.Array      # [Dp_in, Np]   compute_dtype  (dummy if n_layers == 0)
    b0: jax.Array      # [1, Np]       f32
    w_h: jax.Array     # [max(L-1,1), Np, Np] compute_dtype
    b_h: jax.Array     # [max(L-1,1), 1, Np]  f32
    w_out: jax.Array   # [Kp, Dp_out]  compute_dtype
    b_out: jax.Array   # [1, Dp_out]   f32
    d_in: int
    d_out: int
    n_layers: int


def prepare_nn_model_params(weights, biases, compute_dtype=jnp.bfloat16):
    """Pad/stack/cast the NNModel parameters once (hoisted out of the forward).

    `weights[i]` are stored transposed relative to PyTorch: shape [chin, chout].
    """
    n_layers = len(weights) - 1            # number of hidden (Linear+Tanh) layers
    D_in = weights[0].shape[0]
    D_out = weights[-1].shape[1]
    cd = compute_dtype

    Dp_in = _round_up(D_in, LANE)
    Dp_out = _round_up(D_out, LANE)

    if n_layers >= 1:
        N_nodes = weights[0].shape[1]
        Np = _round_up(N_nodes, LANE)

        # First hidden layer (non-square): [Dp_in, Np].
        w0 = jnp.zeros((Dp_in, Np), cd).at[:D_in, :N_nodes].set(
            weights[0].astype(cd))
        b0 = jnp.zeros((1, Np), jnp.float32).at[0, :N_nodes].set(
            biases[0].astype(jnp.float32))

        # Remaining square hidden layers, stacked: [L-1, Np, Np].
        n_stack = n_layers - 1
        w_h = jnp.zeros((max(n_stack, 1), Np, Np), cd)
        b_h = jnp.zeros((max(n_stack, 1), 1, Np), jnp.float32)
        for i in range(n_stack):
            w, b = weights[i + 1], biases[i + 1]
            w_h = w_h.at[i, :w.shape[0], :w.shape[1]].set(w.astype(cd))
            b_h = b_h.at[i, 0, :b.shape[0]].set(b.astype(jnp.float32))
        Kp = Np
    else:
        # Degenerate NNModel(N_layers=0): just Linear(D_in, D_out). Dummies.
        w0 = jnp.zeros((8, LANE), cd)
        b0 = jnp.zeros((1, LANE), jnp.float32)
        w_h = jnp.zeros((1, 8, LANE), cd)
        b_h = jnp.zeros((1, 1, LANE), jnp.float32)
        Kp = Dp_in

    w_last, b_last = weights[-1], biases[-1]
    w_out = jnp.zeros((Kp, Dp_out), cd).at[:w_last.shape[0], :D_out].set(
        w_last.astype(cd))
    b_out = jnp.zeros((1, Dp_out), jnp.float32).at[0, :D_out].set(
        b_last.astype(jnp.float32))

    return PreparedParams(w0, b0, w_h, b_h, w_out, b_out, D_in, D_out, n_layers)


# --------------------------------------------------------------------------- #
# Forward wrapper
# --------------------------------------------------------------------------- #
def nn_model_forward(t, x, params: PreparedParams, *, tile_b=1024):
    """JAX wrapper mirroring NNModel.forward(t, x). `t` is ignored (as in PyTorch)."""
    del t
    B, D_in = x.shape
    assert D_in == params.d_in, (D_in, params.d_in)

    compute_dtype = params.w_out.dtype
    cd_bytes = jnp.dtype(compute_dtype).itemsize
    Dp_in = _round_up(D_in, LANE)
    Dp_out = params.b_out.shape[1]
    n_layers = params.n_layers
    n_stack = max(n_layers - 1, 0)

    # Batch tile: multiple of 16 rows (bf16 sublane packing).  For v7x megacore
    # make sure the grid has >= 2 steps whenever the batch allows it.
    tb = min(tile_b, _round_up(B, 16))
    if B > 16 and _round_up(B, tb) // tb < 2:
        tb = max(16, _round_up((B + 1) // 2, 16))
    B_pad = _round_up(B, tb)
    grid = (B_pad // tb,)

    # Pad input to lane-dense width, stored directly in compute_dtype (halves
    # the per-step activation DMA; no in-kernel cast).  Padded rows/lanes are
    # zero and only multiply zero-padded weight rows, so results are exact.
    x_p = jnp.zeros((B_pad, Dp_in), compute_dtype).at[:B, :D_in].set(
        x.astype(compute_dtype))

    # Explicit scoped-VMEM budget: resident weights (x2 in case the fallback
    # double-buffers them) + double-buffered activation/output tiles + headroom
    # for in-kernel f32 temporaries.
    def nbytes(a):
        return a.size * a.dtype.itemsize
    weight_bytes = sum(nbytes(a) for a in (params.w0, params.b0, params.w_h,
                                           params.b_h, params.w_out, params.b_out))
    io_bytes = 2 * tb * Dp_in * cd_bytes + 2 * tb * Dp_out * x.dtype.itemsize
    act_width = max(params.b0.shape[1], Dp_in, Dp_out)
    act_bytes = 6 * tb * act_width * 4
    needed = 2 * weight_bytes + io_bytes + act_bytes
    vmem_limit = int(min(max(2 * needed, 16 << 20), 48 << 20))

    kernel = functools.partial(_mlp_kernel, n_stack, n_layers >= 1)

    def build(single_buffer_weights):
        def resident(shape):
            kwargs = {}
            if single_buffer_weights:
                kwargs["pipeline_mode"] = pl.Buffered(1)
            if len(shape) == 2:
                imap = lambda i: (0, 0)
            else:
                imap = lambda i: (0, 0, 0)
            return pl.BlockSpec(shape, imap, **kwargs)

        return pl.pallas_call(
            kernel,
            out_shape=jax.ShapeDtypeStruct((B_pad, Dp_out), x.dtype),
            grid=grid,
            in_specs=[
                pl.BlockSpec((tb, Dp_in), lambda i: (i, 0)),   # x: tiled over batch
                resident(params.w0.shape),                     # weights resident
                resident(params.b0.shape),
                resident(params.w_h.shape),
                resident(params.b_h.shape),
                resident(params.w_out.shape),
                resident(params.b_out.shape),
            ],
            out_specs=pl.BlockSpec((tb, Dp_out), lambda i: (i, 0)),
            compiler_params=pltpu.CompilerParams(
                dimension_semantics=("parallel",),             # megacore on v7x
                vmem_limit_bytes=vmem_limit),
        )

    operands = (x_p, params.w0, params.b0, params.w_h, params.b_h,
                params.w_out, params.b_out)
    try:
        out_p = build(True)(*operands)
    except Exception:
        # Fallback: identical results, just default (double) buffering of the
        # constant-index weight operands if pl.Buffered(1) is not supported.
        out_p = build(False)(*operands)

    return out_p[:B, :params.d_out]


# --------------------------------------------------------------------------- #
# Init + reference (for the self-test)
# --------------------------------------------------------------------------- #
def _init_params(key, D_in, D_out, N_nodes, N_layers, dtype=jnp.float32):
    """Deterministic init mimicking nn.Linear's default U(-1/sqrt(fan_in), +).

    Weights stored transposed relative to PyTorch: shape [chin, chout].
    """
    chs = [D_in] + N_layers * [N_nodes] + [D_out]
    weights, biases = [], []
    for i in range(len(chs) - 1):
        chin, chout = chs[i], chs[i + 1]
        key, kw, kb = jax.random.split(key, 3)
        bound = 1.0 / jnp.sqrt(jnp.asarray(chin, dtype=jnp.float32))
        w = jax.random.uniform(kw, (chin, chout), dtype=dtype, minval=-bound, maxval=bound)
        b = jax.random.uniform(kb, (chout,), dtype=dtype, minval=-bound, maxval=bound)
        weights.append(w)
        biases.append(b)
    return weights, biases


def _reference_forward(x, weights, biases, compute_dtype=jnp.float32):
    """Pure-JAX reference of the PyTorch forward pass.

    If compute_dtype != f32 it emulates the kernel's bf16 matmul inputs with
    f32 accumulation, for a tight apples-to-apples comparison.
    """
    h = x.astype(jnp.float32)
    n_layers = len(weights) - 1
    for i, (w, b) in enumerate(zip(weights, biases)):
        z = jnp.dot(h.astype(compute_dtype), w.astype(compute_dtype),
                    preferred_element_type=jnp.float32) + b.astype(jnp.float32)
        h = jnp.tanh(z) if i < n_layers else z
    return h.astype(x.dtype)


if __name__ == "__main__":
    # Small shapes consistent with the module: x is [batch, D_in], t is ignored.
    B, D_in, D_out, N_nodes, N_layers = 8, 16, 4, 32, 3

    key = jax.random.PRNGKey(0)
    key, kx, kt = jax.random.split(key, 3)
    x = jax.random.normal(kx, (B, D_in), dtype=jnp.float32)
    t = jax.random.normal(kt, (B, 1), dtype=jnp.float32)  # ignored, as in PyTorch

    weights, biases = _init_params(key, D_in, D_out, N_nodes, N_layers)

    # One-time prepare step (padding / stacking / bf16 cast) + forward.
    params = prepare_nn_model_params(weights, biases, compute_dtype=jnp.bfloat16)
    out = nn_model_forward(t, x, params)
    out = jax.block_until_ready(out)
    assert out.shape == (B, D_out), out.shape

    # Tight check against a reference that uses the same bf16 matmul inputs.
    ref_bf16 = _reference_forward(x, weights, biases, compute_dtype=jnp.bfloat16)
    err_bf16 = float(jnp.max(jnp.abs(out - ref_bf16)))
    assert err_bf16 < 1e-3, err_bf16

    # Sanity check against the pure-f32 PyTorch-equivalent forward.
    ref_f32 = _reference_forward(x, weights, biases, compute_dtype=jnp.float32)
    err_f32 = float(jnp.max(jnp.abs(out - ref_f32)))
    assert err_f32 < 5e-2, err_f32

    print("KERNEL_OK")
</pallas_src>

<mosaic_0001>
module attributes {stable_mosaic.version = 11 : i64} {
  func.func @_mlp_kernel(%arg0: i32, %arg1: memref<16x128xbf16, #tpu.memory_space<vmem>>, %arg2: memref<128x128xbf16, #tpu.memory_space<vmem>>, %arg3: memref<1x128xf32, #tpu.memory_space<vmem>>, %arg4: memref<2x128x128xbf16, #tpu.memory_space<vmem>>, %arg5: memref<2x1x128xf32, #tpu.memory_space<vmem>>, %arg6: memref<128x128xbf16, #tpu.memory_space<vmem>>, %arg7: memref<1x128xf32, #tpu.memory_space<vmem>>, %arg8: memref<16x128xf32, #tpu.memory_space<vmem>>) attributes {dimension_semantics = [#tpu.dimension_semantics<parallel>], iteration_bounds = array<i64: 1>, scalar_prefetch = 0 : i64, scratch_operands = 0 : i64, tpu.core_type = #tpu.core_type<tc>, window_params = [{transform_indices = @transform_0, window_bounds = array<i64: 16, 128>}, {pipeline_mode = #tpu.pipeline_mode<synchronous>, transform_indices = @transform_1, window_bounds = array<i64: 128, 128>}, {pipeline_mode = #tpu.pipeline_mode<synchronous>, transform_indices = @transform_2, window_bounds = array<i64: 1, 128>}, {pipeline_mode = #tpu.pipeline_mode<synchronous>, transform_indices = @transform_3, window_bounds = array<i64: 2, 128, 128>}, {pipeline_mode = #tpu.pipeline_mode<synchronous>, transform_indices = @transform_4, window_bounds = array<i64: 2, 1, 128>}, {pipeline_mode = #tpu.pipeline_mode<synchronous>, transform_indices = @transform_5, window_bounds = array<i64: 128, 128>}, {pipeline_mode = #tpu.pipeline_mode<synchronous>, transform_indices = @transform_6, window_bounds = array<i64: 1, 128>}, {transform_indices = @transform_7, window_bounds = array<i64: 16, 128>}]} {
    %c0 = arith.constant 0 : index
    %c0_0 = arith.constant 0 : index
    %0 = vector.load %arg1[%c0, %c0_0] : memref<16x128xbf16, #tpu.memory_space<vmem>>, vector<16x128xbf16>
    %c0_1 = arith.constant 0 : index
    %c0_2 = arith.constant 0 : index
    %1 = vector.load %arg2[%c0_1, %c0_2] : memref<128x128xbf16, #tpu.memory_space<vmem>>, vector<128x128xbf16>
    %cst = arith.constant dense<0.000000e+00> : vector<16x128xf32>
    %2 = tpu.matmul %0, %1, %cst {dimension_numbers = #tpu.dot_dimension_numbers<[1], [0], [0], [1], [0, 0, 1, 1], [], []>} : vector<16x128xbf16>, vector<128x128xbf16>, vector<16x128xf32> -> vector<16x128xf32>
    %c0_3 = arith.constant 0 : index
    %c0_4 = arith.constant 0 : index
    %3 = vector.load %arg3[%c0_3, %c0_4] : memref<1x128xf32, #tpu.memory_space<vmem>>, vector<1x128xf32>
    %4 = vector.broadcast %3 : vector<1x128xf32> to vector<16x128xf32>
    %5 = arith.addf %2, %4 : vector<16x128xf32>
    %6 = math.tanh %5 : vector<16x128xf32>
    %c0_i32 = arith.constant 0 : i32
    %7 = arith.truncf %6 : vector<16x128xf32> to vector<16x128xbf16>
    %8 = arith.index_cast %c0_i32 : i32 to index
    %c0_5 = arith.constant 0 : index
    %c0_6 = arith.constant 0 : index
    %9 = vector.load %arg4[%8, %c0_5, %c0_6] : memref<2x128x128xbf16, #tpu.memory_space<vmem>>, vector<1x128x128xbf16>
    %10 = vector.shape_cast %9 : vector<1x128x128xbf16> to vector<128x128xbf16>
    %cst_7 = arith.constant dense<0.000000e+00> : vector<16x128xf32>
    %11 = tpu.matmul %7, %10, %cst_7 {dimension_numbers = #tpu.dot_dimension_numbers<[1], [0], [0], [1], [0, 0, 1, 1], [], []>} : vector<16x128xbf16>, vector<128x128xbf16>, vector<16x128xf32> -> vector<16x128xf32>
    %12 = arith.index_cast %c0_i32 : i32 to index
    %c0_8 = arith.constant 0 : index
    %c0_9 = arith.constant 0 : index
    %13 = vector.load %arg5[%12, %c0_8, %c0_9] : memref<2x1x128xf32, #tpu.memory_space<vmem>>, vector<1x1x128xf32>
    %14 = vector.shape_cast %13 : vector<1x1x128xf32> to vector<1x128xf32>
    %15 = vector.broadcast %14 : vector<1x128xf32> to vector<16x128xf32>
    %16 = arith.addf %11, %15 : vector<16x128xf32>
    %17 = math.tanh %16 : vector<16x128xf32>
    %c1_i32 = arith.constant 1 : i32
    %18 = arith.truncf %17 : vector<16x128xf32> to vector<16x128xbf16>
    %19 = arith.index_cast %c1_i32 : i32 to index
    %c0_10 = arith.constant 0 : index
    %c0_11 = arith.constant 0 : index
    %20 = vector.load %arg4[%19, %c0_10, %c0_11] : memref<2x128x128xbf16, #tpu.memory_space<vmem>>, vector<1x128x128xbf16>
    %21 = vector.shape_cast %20 : vector<1x128x128xbf16> to vector<128x128xbf16>
    %cst_12 = arith.constant dense<0.000000e+00> : vector<16x128xf32>
    %22 = tpu.matmul %18, %21, %cst_12 {dimension_numbers = #tpu.dot_dimension_numbers<[1], [0], [0], [1], [0, 0, 1, 1], [], []>} : vector<16x128xbf16>, vector<128x128xbf16>, vector<16x128xf32> -> vector<16x128xf32>
    %23 = arith.index_cast %c1_i32 : i32 to index
    %c0_13 = arith.constant 0 : index
    %c0_14 = arith.constant 0 : index
    %24 = vector.load %arg5[%23, %c0_13, %c0_14] : memref<2x1x128xf32, #tpu.memory_space<vmem>>, vector<1x1x128xf32>
    %25 = vector.shape_cast %24 : vector<1x1x128xf32> to vector<1x128xf32>
    %26 = vector.broadcast %25 : vector<1x128xf32> to vector<16x128xf32>
    %27 = arith.addf %22, %26 : vector<16x128xf32>
    %28 = math.tanh %27 : vector<16x128xf32>
    %c2_i32 = arith.constant 2 : i32
    %29 = arith.truncf %28 : vector<16x128xf32> to vector<16x128xbf16>
    %c0_15 = arith.constant 0 : index
    %c0_16 = arith.constant 0 : index
    %30 = vector.load %arg6[%c0_15, %c0_16] : memref<128x128xbf16, #tpu.memory_space<vmem>>, vector<128x128xbf16>
    %cst_17 = arith.constant dense<0.000000e+00> : vector<16x128xf32>
    %31 = tpu.matmul %29, %30, %cst_17 {dimension_numbers = #tpu.dot_dimension_numbers<[1], [0], [0], [1], [0, 0, 1, 1], [], []>} : vector<16x128xbf16>, vector<128x128xbf16>, vector<16x128xf32> -> vector<16x128xf32>
    %c0_18 = arith.constant 0 : index
    %c0_19 = arith.constant 0 : index
    %32 = vector.load %arg7[%c0_18, %c0_19] : memref<1x128xf32, #tpu.memory_space<vmem>>, vector<1x128xf32>
    %33 = vector.broadcast %32 : vector<1x128xf32> to vector<16x128xf32>
    %34 = arith.addf %31, %33 : vector<16x128xf32>
    %c0_20 = arith.constant 0 : index
    %c0_21 = arith.constant 0 : index
    %35 = vector.load %arg8[%c0_20, %c0_21] : memref<16x128xf32, #tpu.memory_space<vmem>>, vector<16x128xf32>
    tpu.vector_store %arg8[%c0_20, %c0_21], %34 {strides = array<i32>} : memref<16x128xf32, #tpu.memory_space<vmem>>, vector<16x128xf32>,
    return
  }
  func.func @transform_0(%arg0: i32) -> (i32, i32) {
    %c0_i32 = arith.constant 0 : i32
    %c0_i32_0 = arith.constant 0 : i32
    return %arg0, %c0_i32 : i32, i32
  }
  func.func @transform_1(%arg0: i32) -> (i32, i32) {
    %c0_i32 = arith.constant 0 : i32
    %c0_i32_0 = arith.constant 0 : i32
    %c0_i32_1 = arith.constant 0 : i32
    return %c0_i32, %c0_i32_0 : i32, i32
  }
  func.func @transform_2(%arg0: i32) -> (i32, i32) {
    %c0_i32 = arith.constant 0 : i32
    %c0_i32_0 = arith.constant 0 : i32
    %c0_i32_1 = arith.constant 0 : i32
    return %c0_i32, %c0_i32_0 : i32, i32
  }
  func.func @transform_3(%arg0: i32) -> (i32, i32, i32) {
    %c0_i32 = arith.constant 0 : i32
    %c0_i32_0 = arith.constant 0 : i32
    %c0_i32_1 = arith.constant 0 : i32
    %c0_i32_2 = arith.constant 0 : i32
    return %c0_i32, %c0_i32_0, %c0_i32_1 : i32, i32, i32
  }
  func.func @transform_4(%arg0: i32) -> (i32, i32, i32) {
    %c0_i32 = arith.constant 0 : i32
    %c0_i32_0 = arith.constant 0 : i32
    %c0_i32_1 = arith.constant 0 : i32
    %c0_i32_2 = arith.constant 0 : i32
    return %c0_i32, %c0_i32_0, %c0_i32_1 : i32, i32, i32
  }
  func.func @transform_5(%arg0: i32) -> (i32, i32) {
    %c0_i32 = arith.constant 0 : i32
    %c0_i32_0 = arith.constant 0 : i32
    %c0_i32_1 = arith.constant 0 : i32
    return %c0_i32, %c0_i32_0 : i32, i32
  }
  func.func @transform_6(%arg0: i32) -> (i32, i32) {
    %c0_i32 = arith.constant 0 : i32
    %c0_i32_0 = arith.constant 0 : i32
    %c0_i32_1 = arith.constant 0 : i32
    return %c0_i32, %c0_i32_0 : i32, i32
  }
  func.func @transform_7(%arg0: i32) -> (i32, i32) {
    %c0_i32 = arith.constant 0 : i32
    %c0_i32_0 = arith.constant 0 : i32
    return %arg0, %c0_i32 : i32, i32
  }
}

module attributes {stable_mosaic.version = 11 : i64} {
  func.func @_mlp_kernel(%arg0: i32, %arg1: memref<16x128xbf16, #tpu.memory_space<vmem>>, %arg2: memref<128x128xbf16, #tpu.memory_space<vmem>>, %arg3: memref<1x128xf32, #tpu.memory_space<vmem>>, %arg4: memref<2x128x128xbf16, #tpu.memory_space<vmem>>, %arg5: memref<2x1x128xf32, #tpu.memory_space<vmem>>, %arg6: memref<128x128xbf16, #tpu.memory_space<vmem>>, %arg7: memref<1x128xf32, #tpu.memory_space<vmem>>, %arg8: memref<16x128xf32, #tpu.memory_space<vmem>>) attributes {dimension_semantics = [#tpu.dimension_semantics<parallel>], iteration_bounds = array<i64: 1>, scalar_prefetch = 0 : i64, scratch_operands = 0 : i64, tpu.core_type = #tpu.core_type<tc>, window_params = [{transform_indices = @transform_0, window_bounds = array<i64: 16, 128>}, {pipeline_mode = #tpu.pipeline_mode<synchronous>, transform_indices = @transform_1, window_bounds = array<i64: 128, 128>}, {pipeline_mode = #tpu.pipeline_mode<synchronous>, transform_indices = @transform_2, window_bounds = array<i64: 1, 128>}, {pipeline_mode = #tpu.pipeline_mode<synchronous>, transform_indices = @transform_3, window_bounds = array<i64: 2, 128, 128>}, {pipeline_mode = #tpu.pipeline_mode<synchronous>, transform_indices = @transform_4, window_bounds = array<i64: 2, 1, 128>}, {pipeline_mode = #tpu.pipeline_mode<synchronous>, transform_indices = @transform_5, window_bounds = array<i64: 128, 128>}, {pipeline_mode = #tpu.pipeline_mode<synchronous>, transform_indices = @transform_6, window_bounds = array<i64: 1, 128>}, {transform_indices = @transform_7, window_bounds = array<i64: 16, 128>}]} {
    %c0 = arith.constant 0 : index
    %c0_0 = arith.constant 0 : index
    %0 = vector.load %arg1[%c0, %c0_0] : memref<16x128xbf16, #tpu.memory_space<vmem>>, vector<16x128xbf16>
    %c0_1 = arith.constant 0 : index
    %c0_2 = arith.constant 0 : index
    %1 = vector.load %arg2[%c0_1, %c0_2] : memref<128x128xbf16, #tpu.memory_space<vmem>>, vector<128x128xbf16>
    %cst = arith.constant dense<0.000000e+00> : vector<16x128xf32>
    %2 = tpu.matmul %0, %1, %cst {dimension_numbers = #tpu.dot_dimension_numbers<[1], [0], [0], [1], [0, 0, 1, 1], [], []>} : vector<16x128xbf16>, vector<128x128xbf16>, vector<16x128xf32> -> vector<16x128xf32>
    %c0_3 = arith.constant 0 : index
    %c0_4 = arith.constant 0 : index
    %3 = vector.load %arg3[%c0_3, %c0_4] : memref<1x128xf32, #tpu.memory_space<vmem>>, vector<1x128xf32>
    %4 = vector.broadcast %3 : vector<1x128xf32> to vector<16x128xf32>
    %5 = arith.addf %2, %4 : vector<16x128xf32>
    %6 = math.tanh %5 : vector<16x128xf32>
    %c0_i32 = arith.constant 0 : i32
    %7 = arith.truncf %6 : vector<16x128xf32> to vector<16x128xbf16>
    %8 = arith.index_cast %c0_i32 : i32 to index
    %c0_5 = arith.constant 0 : index
    %c0_6 = arith.constant 0 : index
    %9 = vector.load %arg4[%8, %c0_5, %c0_6] : memref<2x128x128xbf16, #tpu.memory_space<vmem>>, vector<1x128x128xbf16>
    %10 = vector.shape_cast %9 : vector<1x128x128xbf16> to vector<128x128xbf16>
    %cst_7 = arith.constant dense<0.000000e+00> : vector<16x128xf32>
    %11 = tpu.matmul %7, %10, %cst_7 {dimension_numbers = #tpu.dot_dimension_numbers<[1], [0], [0], [1], [0, 0, 1, 1], [], []>} : vector<16x128xbf16>, vector<128x128xbf16>, vector<16x128xf32> -> vector<16x128xf32>
    %12 = arith.index_cast %c0_i32 : i32 to index
    %c0_8 = arith.constant 0 : index
    %c0_9 = arith.constant 0 : index
    %13 = vector.load %arg5[%12, %c0_8, %c0_9] : memref<2x1x128xf32, #tpu.memory_space<vmem>>, vector<1x1x128xf32>
    %14 = vector.shape_cast %13 : vector<1x1x128xf32> to vector<1x128xf32>
    %15 = vector.broadcast %14 : vector<1x128xf32> to vector<16x128xf32>
    %16 = arith.addf %11, %15 : vector<16x128xf32>
    %17 = math.tanh %16 : vector<16x128xf32>
    %c1_i32 = arith.constant 1 : i32
    %18 = arith.truncf %17 : vector<16x128xf32> to vector<16x128xbf16>
    %19 = arith.index_cast %c1_i32 : i32 to index
    %c0_10 = arith.constant 0 : index
    %c0_11 = arith.constant 0 : index
    %20 = vector.load %arg4[%19, %c0_10, %c0_11] : memref<2x128x128xbf16, #tpu.memory_space<vmem>>, vector<1x128x128xbf16>
    %21 = vector.shape_cast %20 : vector<1x128x128xbf16> to vector<128x128xbf16>
    %cst_12 = arith.constant dense<0.000000e+00> : vector<16x128xf32>
    %22 = tpu.matmul %18, %21, %cst_12 {dimension_numbers = #tpu.dot_dimension_numbers<[1], [0], [0], [1], [0, 0, 1, 1], [], []>} : vector<16x128xbf16>, vector<128x128xbf16>, vector<16x128xf32> -> vector<16x128xf32>
    %23 = arith.index_cast %c1_i32 : i32 to index
    %c0_13 = arith.constant 0 : index
    %c0_14 = arith.constant 0 : index
    %24 = vector.load %arg5[%23, %c0_13, %c0_14] : memref<2x1x128xf32, #tpu.memory_space<vmem>>, vector<1x1x128xf32>
    %25 = vector.shape_cast %24 : vector<1x1x128xf32> to vector<1x128xf32>
    %26 = vector.broadcast %25 : vector<1x128xf32> to vector<16x128xf32>
    %27 = arith.addf %22, %26 : vector<16x128xf32>
    %28 = math.tanh %27 : vector<16x128xf32>
    %c2_i32 = arith.constant 2 : i32
    %29 = arith.truncf %28 : vector<16x128xf32> to vector<16x128xbf16>
    %c0_15 = arith.constant 0 : index
    %c0_16 = arith.constant 0 : index
    %30 = vector.load %arg6[%c0_15, %c0_16] : memref<128x128xbf16, #tpu.memory_space<vmem>>, vector<128x128xbf16>
    %cst_17 = arith.constant dense<0.000000e+00> : vector<16x128xf32>
    %31 = tpu.matmul %29, %30, %cst_17 {dimension_numbers = #tpu.dot_dimension_numbers<[1], [0], [0], [1], [0, 0, 1, 1], [], []>} : vector<16x128xbf16>, vector<128x128xbf16>, vector<16x128xf32> -> vector<16x128xf32>
    %c0_18 = arith.constant 0 : index
    %c0_19 = arith.constant 0 : index
    %32 = vector.load %arg7[%c0_18, %c0_19] : memref<1x128xf32, #tpu.memory_space<vmem>>, vector<1x128xf32>
    %33 = vector.broadcast %32 : vector<1x128xf32> to vector<16x128xf32>
    %34 = arith.addf %31, %33 : vector<16x128xf32>
    %c0_20 = arith.constant 0 : index
    %c0_21 = arith.constant 0 : index
    %35 = vector.load %arg8[%c0_20, %c0_21] : memref<16x128xf32, #tpu.memory_space<vmem>>, vector<16x128xf32>
    tpu.vector_store %arg8[%c0_20, %c0_21], %34 {strides = array<i32>} : memref<16x128xf32, #tpu.memory_space<vmem>>, vector<16x128xf32>,
    return
  }
  func.func @transform_0(%arg0: i32) -> (i32, i32) {
    %c0_i32 = arith.constant 0 : i32
    %c0_i32_0 = arith.constant 0 : i32
    return %arg0, %c0_i32 : i32, i32
  }
  func.func @transform_1(%arg0: i32) -> (i32, i32) {
    %c0_i32 = arith.constant 0 : i32
    %c0_i32_0 = arith.constant 0 : i32
    %c0_i32_1 = arith.constant 0 : i32
    return %c0_i32, %c0_i32_0 : i32, i32
  }
  func.func @transform_2(%arg0: i32) -> (i32, i32) {
    %c0_i32 = arith.constant 0 : i32
    %c0_i32_0 = arith.constant 0 : i32
    %c0_i32_1 = arith.constant 0 : i32
    return %c0_i32, %c0_i32_0 : i32, i32
  }
  func.func @transform_3(%arg0: i32) -> (i32, i32, i32) {
    %c0_i32 = arith.constant 0 : i32
    %c0_i32_0 = arith.constant 0 : i32
    %c0_i32_1 = arith.constant 0 : i32
    %c0_i32_2 = arith.constant 0 : i32
    return %c0_i32, %c0_i32_0, %c0_i32_1 : i32, i32, i32
  }
  func.func @transform_4(%arg0: i32) -> (i32, i32, i32) {
    %c0_i32 = arith.constant 0 : i32
    %c0_i32_0 = arith.constant 0 : i32
    %c0_i32_1 = arith.constant 0 : i32
    %c0_i32_2 = arith.constant 0 : i32
    return %c0_i32, %c0_i32_0, %c0_i32_1 : i32, i32, i32
  }
  func.func @transform_5(%arg0: i32) -> (i32, i32) {
    %c0_i32 = arith.constant 0 : i32
    %c0_i32_0 = arith.constant 0 : i32
    %c0_i32_1 = arith.constant 0 : i32
    return %c0_i32, %c0_i32_0 : i32, i32
  }
  func.func @transform_6(%arg0: i32) -> (i32, i32) {
    %c0_i32 = arith.constant 0 : i32
    %c0_i32_0 = arith.constant 0 : i32
    %c0_i32_1 = arith.constant 0 : i32
    return %c0_i32, %c0_i32_0 : i32, i32
  }
  func.func @transform_7(%arg0: i32) -> (i32, i32) {
    %c0_i32 = arith.constant 0 : i32
    %c0_i32_0 = arith.constant 0 : i32
    return %arg0, %c0_i32 : i32, i32
  }
}

</mosaic_0001>

<bundles_post_ra>
// kernel: tpu_custom_call.1
= control target key start
LH: loop header
LB: loop body
LE: loop exit
PB: predicated region body
PF: predicated region fallthrough
CT: control target
= control target key end

     0   :  { %12 = vsyncpa [#allocation3], 0  ;;  %s1088_s0 = inlined_call_operand.hbm [shape: bf16[16,128], index: 0, kind: input, shape index: {}]   ;;  %s1089_s1 = inlined_call_operand.hbm [shape: bf16[128,128], index: 1, kind: input, shape index: {}]   ;;  %s1090_s2 = inlined_call_operand.vmem [shape: f32[1,128], index: 2, kind: input, shape index: {}]   ;;  %s1091_s3 = inlined_call_operand.hbm [shape: bf16[2,128,128], index: 3, kind: input, shape index: {}]   ;;  %s1092_s4 = inlined_call_operand.vmem [shape: f32[2,1,128], index: 4, kind: input, shape index: {}]   ;;  %s1093_s5 = inlined_call_operand.hbm [shape: bf16[128,128], index: 5, kind: input, shape index: {}]   ;;  %s1094_s6 = inlined_call_operand.vmem [shape: f32[1,128], index: 6, kind: input, shape index: {}]   ;;  %s1095_s7 = inlined_call_operand.hbm [shape: f32[16,128], index: 7, kind: output, shape index: {}]  }
   0x1   :  { %13 = vsyncpa [#allocation6], 0 }
   0x2   :  { %14 = vsyncpa [#allocation9], 0 }
   0x3   :  { %15 = vsyncpa [#allocation4], 0  ;;  %s899_s24 = smov [#allocation5]   ;;  %s900_s26 = smov [#allocation2]  }
   0x4   :  { %s33_s25 = sshll.u32 %s899_s24, 4  ;;  %s21_s27 = sshll.u32 %s900_s26, 4  ;;  %s34_s25 = int_to_ptr.vmem [resolvable:$true] %s33_s25  ;;  %s950_s27 = int_to_ptr.vmem [resolvable:$true] %s21_s27 }
   0x5   :  { %s781_s30 = scalar_lea.hbm %s1089_s1, 1024 }
   0x6   :  { %p782_p0 = scmp.ne.s32.totalorder %s1089_s1, %s781_s30  ;;  %p785_p1 = scmp.lt.u32.totalorder %s781_s30, %s1089_s1 }
   0x8   :  { %p787_p2 = pnand %p785_p1, %p782_p0 }
   0xa   :  { %790 = shalt.err (!%p787_p2)
}
   0xb   :  { %s791_s12 = scalar_lea.vmem %s34_s25, 1024  ;;  %p796_p4 = scmp.lt.s32.totalorder %s34_s25, %s34_s25 }
   0xc   :  { %p792_p3 = scmp.ne.s32.totalorder %s34_s25, %s791_s12  ;;  %p797_p5 = scmp.lt.s32.totalorder %s791_s12, %s791_s12 }
   0xe   :  { %p798_p6 = por %p797_p5, %p796_p4 }
  0x10   :  { %p799_p7 = pnand %p798_p6, %p792_p3 }
  0x12   :  { %802 = shalt.err (!%p799_p7)
}
  0x13   :  { %s901_s13 = smov 64   ;;  %s902_s14 = smov 4  }
  0x14   :  { %39 = dma.hbm_to_vmem [thread:$0]  %s1089_s1, 1024, %s34_s25, [#allocation6], %s901_s13, %s901_s13, %s902_s14  }
  0x15   :  { %s803_s19 = scalar_lea.hbm %s1088_s0, 128 }
  0x16   :  { %p804_p8 = scmp.ne.s32.totalorder %s1088_s0, %s803_s19  ;;  %p807_p9 = scmp.lt.u32.totalorder %s803_s19, %s1088_s0 }
  0x18   :  { %p809_p10 = pnand %p807_p9, %p804_p8 }
  0x1a   :  { %812 = shalt.err (!%p809_p10)
}
  0x1b   :  { %s813_s24 = scalar_lea.vmem %s950_s27, 128  ;;  %p818_p12 = scmp.lt.s32.totalorder %s950_s27, %s950_s27 }
  0x1c   :  { %p814_p11 = scmp.ne.s32.totalorder %s950_s27, %s813_s24  ;;  %p819_p13 = scmp.lt.s32.totalorder %s813_s24, %s813_s24 }
  0x1e   :  { %p820_p0 = por %p819_p13, %p818_p12 }
  0x20   :  { %p821_p1 = pnand %p820_p0, %p814_p11 }
  0x22   :  { %824 = shalt.err (!%p821_p1)
}
  0x23   :  { %27 = dma.hbm_to_vmem [thread:$0]  %s1088_s0, 128, %s950_s27, [#allocation3], %s901_s13, %s901_s13, %s902_s14  }
  0x24   :  { %s903_s26 = smov [#allocation7]   ;;  %s904_s29 = smov [#allocation8]  }
  0x25   :  { %s47_s28 = sshll.u32 %s903_s26, 4  ;;  %s61_s30 = sshll.u32 %s904_s29, 4  ;;  %s48_s28 = int_to_ptr.vmem [resolvable:$true] %s47_s28  ;;  %s987_s30 = int_to_ptr.vmem [resolvable:$true] %s61_s30 }
  0x26   :  { %s825_s10 = scalar_lea.hbm %s1091_s3, 2048 }
  0x27   :  { %p826_p2 = scmp.ne.s32.totalorder %s1091_s3, %s825_s10  ;;  %p829_p3 = scmp.lt.u32.totalorder %s825_s10, %s1091_s3 }
  0x29   :  { %p831_p4 = pnand %p829_p3, %p826_p2 }
  0x2b   :  { %834 = shalt.err (!%p831_p4)
}
  0x2c   :  { %s835_s0 = scalar_lea.vmem %s48_s28, 2048  ;;  %p840_p6 = scmp.lt.s32.totalorder %s48_s28, %s48_s28 }
  0x2d   :  { %p836_p5 = scmp.ne.s32.totalorder %s48_s28, %s835_s0  ;;  %p841_p7 = scmp.lt.s32.totalorder %s835_s0, %s835_s0 }
  0x2f   :  { %p842_p8 = por %p841_p7, %p840_p6 }
  0x31   :  { %p843_p9 = pnand %p842_p8, %p836_p5 }
  0x33   :  { %846 = shalt.err (!%p843_p9)
}
  0x34   :  { %53 = dma.hbm_to_vmem [thread:$0]  %s1091_s3, 2048, %s48_s28, [#allocation6], %s901_s13, %s901_s13, %s902_s14  }
  0x35   :  { %s847_s20 = scalar_lea.hbm %s1093_s5, 1024 }
  0x36   :  { %p848_p10 = scmp.ne.s32.totalorder %s1093_s5, %s847_s20  ;;  %p851_p11 = scmp.lt.u32.totalorder %s847_s20, %s1093_s5 }
  0x38   :  { %p853_p12 = pnand %p851_p11, %p848_p10 }
  0x3a   :  { %856 = shalt.err (!%p853_p12)
}
  0x3b   :  { %s857_s1 = scalar_lea.vmem %s987_s30, 1024  ;;  %p862_p0 = scmp.lt.s32.totalorder %s987_s30, %s987_s30 }
  0x3c   :  { %p858_p13 = scmp.ne.s32.totalorder %s987_s30, %s857_s1  ;;  %p863_p1 = scmp.lt.s32.totalorder %s857_s1, %s857_s1 }
  0x3e   :  { %p864_p2 = por %p863_p1, %p862_p0 }
  0x40   :  { %p865_p3 = pnand %p864_p2, %p858_p13 }
  0x42   :  { %868 = shalt.err (!%p865_p3)
}
  0x43   :  { %67 = dma.hbm_to_vmem [thread:$0]  %s1093_s5, 1024, %s987_s30, [#allocation9], %s901_s13, %s901_s13, %s902_s14  }
  0x44   :  { %891 = dma.done.wait [#allocation3], 128  }
  0x45   :  { %892 = vsyncadd [#allocation3], 4294967168 }
  0x46   :  { %893 = dma.done.wait [#allocation6], 3072  }
  0x47   :  { %894 = vsyncadd [#allocation6], 4294964224 }
  0x48   :  { %895 = dma.done.wait [#allocation9], 1024  }
  0x49   :  { %896 = vsyncadd [#allocation9], 4294966272  ;;  %v905_v0 = vmov 0.0   ;;  %vm906_vm0 = vmmov 0   ;;  %v736_v1 = vld [vmem:[#allocation5] sm:$0xff]   ;;  %v737_v2 = vld [vmem:[#allocation5 + $0x8] sm:$0xff]  }
  0x4a   :  { %645 = vmatprep.subr.bf16.mxu0 %v905_v0  ;;  %661 = vmatprep.mubr.msk.bf16.mxu0 %vm906_vm0, %v905_v0  ;;  %v738_v3 = vld [vmem:[#allocation5 + $0x10] sm:$0xff]   ;;  %v745_v4 = vld [vmem:[#allocation7] sm:$0xff]   ;;  %v739_v5 = vld [vmem:[#allocation5 + $0x18] sm:$0xff]   ;;  %s907_s8 = smov [#allocation10]  }
  0x4b   :  { %665 = vmatprep.subr.bf16.mxu1 %v905_v0  ;;  %681 = vmatprep.mubr.msk.bf16.mxu1 %vm906_vm0, %v905_v0  ;;  %v746_v6 = vld [vmem:[#allocation7 + $0x8] sm:$0xff]   ;;  %v740_v7 = vld [vmem:[#allocation5 + $0x20] sm:$0xff]   ;;  %v747_v8 = vld [vmem:[#allocation7 + $0x10] sm:$0xff]   ;;  %s557_s9 = sshll.u32 %s907_s8, 4  ;;  %s558_s9 = int_to_ptr.vmem [resolvable:$true] %s557_s9 }
  0x4c   :  { %646 = vmatpush3.bf16.msra.mxu0 %v736_v1  ;;  %666 = vmatpush3.bf16.msra.mxu1 %v745_v4  ;;  %v741_v9 = vld [vmem:[#allocation5 + $0x28] sm:$0xff]   ;;  %v748_v10 = vld [vmem:[#allocation7 + $0x18] sm:$0xff]   ;;  %v742_v11 = vld [vmem:[#allocation5 + $0x30] sm:$0xff]   ;;  %p874_p5 = scmp.lt.s32.totalorder %s558_s9, %s558_s9 }
  0x4d   :  { %647 = vmatprep.subr.bf16.mxu0 %v905_v0  ;;  %667 = vmatprep.subr.bf16.mxu1 %v905_v0  ;;  %v743_v12 = vld [vmem:[#allocation5 + $0x38] sm:$0xff]   ;;  %v749_v14 = vld [vmem:[#allocation7 + $0x20] sm:$0xff]   ;;  %v750_v15 = vld [vmem:[#allocation7 + $0x28] sm:$0xff]  }
  0x4e   :  { %v744_v13 = vld [vmem:[#allocation2] sm:$0xff]   ;;  %v751_v16 = vld [vmem:[#allocation7 + $0x30] sm:$0xff]   ;;  %v753_v18 = vld [vmem:[#allocation7 + $0x40] sm:$0xff]  }
  0x4f   :  { %v752_v17 = vld [vmem:[#allocation7 + $0x38] sm:$0xff]   ;;  %v754_v19 = vld [vmem:[#allocation7 + $0x48] sm:$0xff]   ;;  %v755_v20 = vld [vmem:[#allocation7 + $0x50] sm:$0xff]  }
  0x50   :  { %648 = vmatpush3.bf16.msra.mxu0 %v737_v2  ;;  %668 = vmatpush3.bf16.msra.mxu1 %v746_v6  ;;  %v756_v21 = vld [vmem:[#allocation7 + $0x58] sm:$0xff]   ;;  %v757_v32 = vld [vmem:[#allocation7 + $0x60] sm:$0xff]   ;;  %v758_v33 = vld [vmem:[#allocation7 + $0x68] sm:$0xff]  }
  0x51   :  { %649 = vmatprep.subr.bf16.mxu0 %v905_v0  ;;  %669 = vmatprep.subr.bf16.mxu1 %v905_v0  ;;  %v571_v22 = vld [vmem:[%s1090_s2] ss:$0 sm:$0xff]  ;;  %v759_v34 = vld [vmem:[#allocation7 + $0x70] sm:$0xff]   ;;  %v761_v36 = vld [vmem:[#allocation8] sm:$0xff]  }
  0x52   :  { %v760_v35 = vld [vmem:[#allocation7 + $0x78] sm:$0xff]   ;;  %v762_v37 = vld [vmem:[#allocation8 + $0x8] sm:$0xff]   ;;  %v763_v38 = vld [vmem:[#allocation8 + $0x10] sm:$0xff]  }
  0x53   :  { %v764_v39 = vld [vmem:[#allocation8 + $0x18] sm:$0xff]   ;;  %v765_v50 = vld [vmem:[#allocation8 + $0x20] sm:$0xff]   ;;  %v766_v51 = vld [vmem:[#allocation8 + $0x28] sm:$0xff]  }
  0x54   :  { %650 = vmatpush3.bf16.msra.mxu0 %v738_v3  ;;  %670 = vmatpush3.bf16.msra.mxu1 %v747_v8  ;;  %v581_v40 = vld [vmem:[%s1092_s4] ss:$0 sm:$0xff]  ;;  %v767_v52 = vld [vmem:[#allocation8 + $0x30] sm:$0xff]   ;;  %v591_v54 = vld [vmem:[%s1092_s4 + $0x1] ss:$0 sm:$0xff]  ;;  %s869_s4 = scalar_lea.vmem %s558_s9, 256 }
  0x55   :  { %651 = vmatprep.subr.bf16.mxu0 %v905_v0  ;;  %671 = vmatprep.subr.bf16.mxu1 %v905_v0  ;;  %v768_v53 = vld [vmem:[#allocation8 + $0x38] sm:$0xff]   ;;  %p870_p4 = scmp.ne.s32.totalorder %s558_s9, %s869_s4  ;;  %p875_p6 = scmp.lt.s32.totalorder %s869_s4, %s869_s4 }
  0x57   :  { %p876_p7 = por %p875_p6, %p874_p5 }
  0x58   :  { %652 = vmatpush3.bf16.msra.mxu0 %v739_v5  ;;  %672 = vmatpush3.bf16.msra.mxu1 %v748_v10 }
  0x59   :  { %653 = vmatprep.subr.bf16.mxu0 %v905_v0  ;;  %673 = vmatprep.subr.bf16.mxu1 %v905_v0  ;;  %p877_p8 = pnand %p876_p7, %p870_p4 }
  0x5c   :  { %654 = vmatpush3.bf16.msra.mxu0 %v740_v7  ;;  %674 = vmatpush3.bf16.msra.mxu1 %v749_v14 }
  0x5d   :  { %655 = vmatprep.subr.bf16.mxu0 %v905_v0  ;;  %675 = vmatprep.subr.bf16.mxu1 %v905_v0 }
  0x60   :  { %656 = vmatpush3.bf16.msra.mxu0 %v741_v9  ;;  %676 = vmatpush3.bf16.msra.mxu1 %v750_v15 }
  0x61   :  { %657 = vmatprep.subr.bf16.mxu0 %v905_v0  ;;  %677 = vmatprep.subr.bf16.mxu1 %v905_v0 }
  0x64   :  { %658 = vmatpush3.bf16.msra.mxu0 %v742_v11  ;;  %678 = vmatpush3.bf16.msra.mxu1 %v751_v16 }
  0x65   :  { %659 = vmatprep.subr.bf16.mxu0 %v905_v0  ;;  %679 = vmatprep.subr.bf16.mxu1 %v905_v0 }
  0x68   :  { %660 = vmatpush3.bf16.msra.mxu0 %v743_v12  ;;  %680 = vmatpush3.bf16.msra.mxu1 %v752_v17 }
  0x69   :  { %685 = vmatprep.subr.bf16.mxu0 %v905_v0  ;;  %705 = vmatprep.subr.bf16.mxu1 %v905_v0 }
  0x6b   :  { %662 = vmatmul.mubr.bf16.vlgmr.msra.gmra.mrb[0].mxu0 %v744_v13 }
  0x6c   :  { %701 = vmatprep.mubr.msk.bf16.mxu0 %vm906_vm0, %v905_v0  ;;  %686 = vmatpush3.bf16.msra.mxu0 %v753_v18 }
  0x6d   :  { %687 = vmatprep.subr.bf16.mxu0 %v905_v0 }
  0x70   :  { %688 = vmatpush3.bf16.msra.mxu0 %v754_v19 }
  0x71   :  { %689 = vmatprep.subr.bf16.mxu0 %v905_v0 }
  0x74   :  { %690 = vmatpush3.bf16.msra.mxu0 %v755_v20 }
  0x75   :  { %691 = vmatprep.subr.bf16.mxu0 %v905_v0 }
  0x78   :  { %692 = vmatpush3.bf16.msra.mxu0 %v756_v21 }
  0x79   :  { %693 = vmatprep.subr.bf16.mxu0 %v905_v0 }
  0x7c   :  { %694 = vmatpush3.bf16.msra.mxu0 %v757_v32 }
  0x7d   :  { %695 = vmatprep.subr.bf16.mxu0 %v905_v0 }
  0x80   :  { %696 = vmatpush3.bf16.msra.mxu0 %v758_v33 }
  0x81   :  { %697 = vmatprep.subr.bf16.mxu0 %v905_v0 }
  0x84   :  { %698 = vmatpush3.bf16.msra.mxu0 %v759_v34 }
  0x85   :  { %699 = vmatprep.subr.bf16.mxu0 %v905_v0 }
  0x88   :  { %700 = vmatpush3.bf16.msra.mxu0 %v760_v35 }
 0x13e   :  { %v196_v23 = vpop.f32.mrb[0].mxu0 }
 0x13f   :  { %v197_v24 = vadd.f32 %v571_v22, %v196_v23  ;;  %v663_v25 = vpop.f32.mrb[1].mxu0 }
 0x140   :  { %v199_v26 = vpop.f32.mrb[2].mxu0 }
 0x141   :  { %v200_v27 = vadd.f32 %v571_v22, %v199_v26  ;;  %v664_v28 = vpop.f32.mrb[3].mxu0  ;;  %769 = vtanh.f32 %v197_v24 }
 0x143   :  { %771 = vtanh.f32 %v200_v27 }
 0x14b   :  { %v770_v29 = vpop.eup %769 }
 0x14d   :  { %v772_v30 = vpop.eup %771 }
 0x14e   :  { %v205_v31 = vpack.c.bf16 %v772_v30, %v770_v29 }
 0x150   :  { %682 = vmatmul.mubr.bf16.vlgmr.msra.gmra.mrb[0].mxu1 %v205_v31 }
 0x151   :  { %721 = vmatprep.mubr.msk.bf16.mxu1 %vm906_vm0, %v905_v0  ;;  %706 = vmatpush3.bf16.msra.mxu1 %v761_v36 }
 0x152   :  { %707 = vmatprep.subr.bf16.mxu1 %v905_v0 }
 0x155   :  { %708 = vmatpush3.bf16.msra.mxu1 %v762_v37 }
 0x156   :  { %709 = vmatprep.subr.bf16.mxu1 %v905_v0 }
 0x159   :  { %710 = vmatpush3.bf16.msra.mxu1 %v763_v38 }
 0x15a   :  { %711 = vmatprep.subr.bf16.mxu1 %v905_v0 }
 0x15d   :  { %712 = vmatpush3.bf16.msra.mxu1 %v764_v39 }
 0x15e   :  { %713 = vmatprep.subr.bf16.mxu1 %v905_v0 }
 0x161   :  { %714 = vmatpush3.bf16.msra.mxu1 %v765_v50 }
 0x162   :  { %715 = vmatprep.subr.bf16.mxu1 %v905_v0 }
 0x165   :  { %716 = vmatpush3.bf16.msra.mxu1 %v766_v51 }
 0x166   :  { %717 = vmatprep.subr.bf16.mxu1 %v905_v0 }
 0x169   :  { %718 = vmatpush3.bf16.msra.mxu1 %v767_v52 }
 0x16a   :  { %719 = vmatprep.subr.bf16.mxu1 %v905_v0  ;;  %v600_v0 = vld [vmem:[%s1094_s6] ss:$0 sm:$0xff] }
 0x16d   :  { %720 = vmatpush3.bf16.msra.mxu1 %v768_v53 }
 0x223   :  { %v311_v41 = vpop.f32.mrb[0].mxu1 }
 0x224   :  { %v312_v42 = vadd.f32 %v581_v40, %v311_v41  ;;  %v683_v43 = vpop.f32.mrb[1].mxu1 }
 0x225   :  { %v314_v44 = vpop.f32.mrb[2].mxu1 }
 0x226   :  { %v315_v45 = vadd.f32 %v581_v40, %v314_v44  ;;  %v684_v46 = vpop.f32.mrb[3].mxu1  ;;  %773 = vtanh.f32 %v312_v42 }
 0x228   :  { %775 = vtanh.f32 %v315_v45 }
 0x230   :  { %v774_v47 = vpop.eup %773 }
 0x232   :  { %v776_v48 = vpop.eup %775 }
 0x233   :  { %v320_v49 = vpack.c.bf16 %v776_v48, %v774_v47 }
 0x235   :  { %702 = vmatmul.mubr.bf16.vlgmr.msra.gmra.mrb[4].mxu0 %v320_v49 }
 0x308   :  { %v428_v55 = vpop.f32.mrb[4].mxu0 }
 0x309   :  { %v429_v56 = vadd.f32 %v591_v54, %v428_v55  ;;  %v703_v57 = vpop.f32.mrb[5].mxu0 }
 0x30a   :  { %v431_v58 = vpop.f32.mrb[6].mxu0 }
 0x30b   :  { %v432_v59 = vadd.f32 %v591_v54, %v431_v58  ;;  %v704_v60 = vpop.f32.mrb[7].mxu0  ;;  %777 = vtanh.f32 %v429_v56 }
 0x30d   :  { %779 = vtanh.f32 %v432_v59 }
 0x315   :  { %v778_v61 = vpop.eup %777 }
 0x317   :  { %v780_v62 = vpop.eup %779 }
 0x318   :  { %v437_v63 = vpack.c.bf16 %v780_v62, %v778_v61 }
 0x31a   :  { %722 = vmatmul.mubr.bf16.vlgmr.msra.gmra.mrb[4].mxu1 %v437_v63 }
 0x3ed   :  { %v543_v1 = vpop.f32.mrb[4].mxu1 }
 0x3ee   :  { %v544_v2 = vadd.f32 %v600_v0, %v543_v1  ;;  %v723_v3 = vpop.f32.mrb[5].mxu1 }
 0x3ef   :  { %v546_v4 = vpop.f32.mrb[6].mxu1 }
 0x3f0   :  { %550 = vst [vmem:[#allocation10] sm:$0xff] %v544_v2  ;;  %v547_v5 = vadd.f32 %v600_v0, %v546_v4  ;;  %v724_v6 = vpop.f32.mrb[7].mxu1 }
 0x3f2   :  { %551 = vst [vmem:[#allocation10 + $0x8] sm:$0xff] %v547_v5 }
 0x3f3   :  { %880 = shalt.err (!%p877_p8)
}
 0x3f4   :  { %s881_s11 = scalar_lea.hbm %s1095_s7, 256 }
 0x3f5   :  { %p882_p9 = scmp.ne.s32.totalorder %s1095_s7, %s881_s11  ;;  %p885_p10 = scmp.lt.u32.totalorder %s881_s11, %s1095_s7 }
 0x3f7   :  { %p887_p11 = pnand %p885_p10, %p882_p9 }
 0x3f9   :  { %890 = shalt.err (!%p887_p11)
}
 0x3fa   :  { %s908_s27 = smov 128   ;;  %s909_s17 = smov 8  }
 0x3fb   :  { %563 = dma.vmem_to_hbm [thread:$0]  %s558_s9, 256, %s1095_s7, [#allocation4], %s908_s27, %s908_s27, %s909_s17  }
 0x3fc   :  { %897 = dma.done.wait [#allocation4], 256  }
 0x3fd   :  { %898 = vsyncadd [#allocation4], 4294967040 }
 0x3fe   :  { %567 = vsyncpa [#allocation3], 1 }
 0x3ff   :  { %568 = vsyncpa [#allocation6], 1 }
 0x400   :  { %569 = vsyncpa [#allocation9], 1 }
 0x401   :  { %570 = vsyncpa [#allocation4], 1 }

// kernel: tpu_custom_call.1
= control target key start
LH: loop header
LB: loop body
LE: loop exit
PB: predicated region body
PF: predicated region fallthrough
CT: control target
= control target key end

     0   :  { %12 = vsyncpa [#allocation3], 0  ;;  %s1088_s0 = inlined_call_operand.hbm [shape: bf16[16,128], index: 0, kind: input, shape index: {}]   ;;  %s1089_s1 = inlined_call_operand.hbm [shape: bf16[128,128], index: 1, kind: input, shape index: {}]   ;;  %s1090_s2 = inlined_call_operand.vmem [shape: f32[1,128], index: 2, kind: input, shape index: {}]   ;;  %s1091_s3 = inlined_call_operand.hbm [shape: bf16[2,128,128], index: 3, kind: input, shape index: {}]   ;;  %s1092_s4 = inlined_call_operand.vmem [shape: f32[2,1,128], index: 4, kind: input, shape index: {}]   ;;  %s1093_s5 = inlined_call_operand.hbm [shape: bf16[128,128], index: 5, kind: input, shape index: {}]   ;;  %s1094_s6 = inlined_call_operand.vmem [shape: f32[1,128], index: 6, kind: input, shape index: {}]   ;;  %s1095_s7 = inlined_call_operand.hbm [shape: f32[16,128], index: 7, kind: output, shape index: {}]  }
   0x1   :  { %13 = vsyncpa [#allocation6], 0 }
   0x2   :  { %14 = vsyncpa [#allocation9], 0 }
   0x3   :  { %15 = vsyncpa [#allocation4], 0  ;;  %s899_s24 = smov [#allocation5]   ;;  %s900_s26 = smov [#allocation2]  }
   0x4   :  { %s33_s25 = sshll.u32 %s899_s24, 4  ;;  %s21_s27 = sshll.u32 %s900_s26, 4  ;;  %s34_s25 = int_to_ptr.vmem [resolvable:$true] %s33_s25  ;;  %s950_s27 = int_to_ptr.vmem [resolvable:$true] %s21_s27 }
   0x5   :  { %s781_s30 = scalar_lea.hbm %s1089_s1, 1024 }
   0x6   :  { %p782_p0 = scmp.ne.s32.totalorder %s1089_s1, %s781_s30  ;;  %p785_p1 = scmp.lt.u32.totalorder %s781_s30, %s1089_s1 }
   0x8   :  { %p787_p2 = pnand %p785_p1, %p782_p0 }
   0xa   :  { %790 = shalt.err (!%p787_p2)
}
   0xb   :  { %s791_s12 = scalar_lea.vmem %s34_s25, 1024  ;;  %p796_p4 = scmp.lt.s32.totalorder %s34_s25, %s34_s25 }
   0xc   :  { %p792_p3 = scmp.ne.s32.totalorder %s34_s25, %s791_s12  ;;  %p797_p5 = scmp.lt.s32.totalorder %s791_s12, %s791_s12 }
   0xe   :  { %p798_p6 = por %p797_p5, %p796_p4 }
  0x10   :  { %p799_p7 = pnand %p798_p6, %p792_p3 }
  0x12   :  { %802 = shalt.err (!%p799_p7)
}
  0x13   :  { %s901_s13 = smov 64   ;;  %s902_s14 = smov 4  }
  0x14   :  { %39 = dma.hbm_to_vmem [thread:$0]  %s1089_s1, 1024, %s34_s25, [#allocation6], %s901_s13, %s901_s13, %s902_s14  }
  0x15   :  { %s803_s19 = scalar_lea.hbm %s1088_s0, 128 }
  0x16   :  { %p804_p8 = scmp.ne.s32.totalorder %s1088_s0, %s803_s19  ;;  %p807_p9 = scmp.lt.u32.totalorder %s803_s19, %s1088_s0 }
  0x18   :  { %p809_p10 = pnand %p807_p9, %p804_p8 }
  0x1a   :  { %812 = shalt.err (!%p809_p10)
}
  0x1b   :  { %s813_s24 = scalar_lea.vmem %s950_s27, 128  ;;  %p818_p12 = scmp.lt.s32.totalorder %s950_s27, %s950_s27 }
  0x1c   :  { %p814_p11 = scmp.ne.s32.totalorder %s950_s27, %s813_s24  ;;  %p819_p13 = scmp.lt.s32.totalorder %s813_s24, %s813_s24 }
  0x1e   :  { %p820_p0 = por %p819_p13, %p818_p12 }
  0x20   :  { %p821_p1 = pnand %p820_p0, %p814_p11 }
  0x22   :  { %824 = shalt.err (!%p821_p1)
}
  0x23   :  { %27 = dma.hbm_to_vmem [thread:$0]  %s1088_s0, 128, %s950_s27, [#allocation3], %s901_s13, %s901_s13, %s902_s14  }
  0x24   :  { %s903_s26 = smov [#allocation7]   ;;  %s904_s29 = smov [#allocation8]  }
  0x25   :  { %s47_s28 = sshll.u32 %s903_s26, 4  ;;  %s61_s30 = sshll.u32 %s904_s29, 4  ;;  %s48_s28 = int_to_ptr.vmem [resolvable:$true] %s47_s28  ;;  %s987_s30 = int_to_ptr.vmem [resolvable:$true] %s61_s30 }
  0x26   :  { %s825_s10 = scalar_lea.hbm %s1091_s3, 2048 }
  0x27   :  { %p826_p2 = scmp.ne.s32.totalorder %s1091_s3, %s825_s10  ;;  %p829_p3 = scmp.lt.u32.totalorder %s825_s10, %s1091_s3 }
  0x29   :  { %p831_p4 = pnand %p829_p3, %p826_p2 }
  0x2b   :  { %834 = shalt.err (!%p831_p4)
}
  0x2c   :  { %s835_s0 = scalar_lea.vmem %s48_s28, 2048  ;;  %p840_p6 = scmp.lt.s32.totalorder %s48_s28, %s48_s28 }
  0x2d   :  { %p836_p5 = scmp.ne.s32.totalorder %s48_s28, %s835_s0  ;;  %p841_p7 = scmp.lt.s32.totalorder %s835_s0, %s835_s0 }
  0x2f   :  { %p842_p8 = por %p841_p7, %p840_p6 }
  0x31   :  { %p843_p9 = pnand %p842_p8, %p836_p5 }
  0x33   :  { %846 = shalt.err (!%p843_p9)
}
  0x34   :  { %53 = dma.hbm_to_vmem [thread:$0]  %s1091_s3, 2048, %s48_s28, [#allocation6], %s901_s13, %s901_s13, %s902_s14  }
  0x35   :  { %s847_s20 = scalar_lea.hbm %s1093_s5, 1024 }
  0x36   :  { %p848_p10 = scmp.ne.s32.totalorder %s1093_s5, %s847_s20  ;;  %p851_p11 = scmp.lt.u32.totalorder %s847_s20, %s1093_s5 }
  0x38   :  { %p853_p12 = pnand %p851_p11, %p848_p10 }
  0x3a   :  { %856 = shalt.err (!%p853_p12)
}
  0x3b   :  { %s857_s1 = scalar_lea.vmem %s987_s30, 1024  ;;  %p862_p0 = scmp.lt.s32.totalorder %s987_s30, %s987_s30 }
  0x3c   :  { %p858_p13 = scmp.ne.s32.totalorder %s987_s30, %s857_s1  ;;  %p863_p1 = scmp.lt.s32.totalorder %s857_s1, %s857_s1 }
  0x3e   :  { %p864_p2 = por %p863_p1, %p862_p0 }
  0x40   :  { %p865_p3 = pnand %p864_p2, %p858_p13 }
  0x42   :  { %868 = shalt.err (!%p865_p3)
}
  0x43   :  { %67 = dma.hbm_to_vmem [thread:$0]  %s1093_s5, 1024, %s987_s30, [#allocation9], %s901_s13, %s901_s13, %s902_s14  }
  0x44   :  { %891 = dma.done.wait [#allocation3], 128  }
  0x45   :  { %892 = vsyncadd [#allocation3], 4294967168 }
  0x46   :  { %893 = dma.done.wait [#allocation6], 3072  }
  0x47   :  { %894 = vsyncadd [#allocation6], 4294964224 }
  0x48   :  { %895 = dma.done.wait [#allocation9], 1024  }
  0x49   :  { %896 = vsyncadd [#allocation9], 4294966272  ;;  %v905_v0 = vmov 0.0   ;;  %vm906_vm0 = vmmov 0   ;;  %v736_v1 = vld [vmem:[#allocation5] sm:$0xff]   ;;  %v737_v2 = vld [vmem:[#allocation5 + $0x8] sm:$0xff]  }
  0x4a   :  { %645 = vmatprep.subr.bf16.mxu0 %v905_v0  ;;  %661 = vmatprep.mubr.msk.bf16.mxu0 %vm906_vm0, %v905_v0  ;;  %v738_v3 = vld [vmem:[#allocation5 + $0x10] sm:$0xff]   ;;  %v745_v4 = vld [vmem:[#allocation7] sm:$0xff]   ;;  %v739_v5 = vld [vmem:[#allocation5 + $0x18] sm:$0xff]   ;;  %s907_s8 = smov [#allocation10]  }
  0x4b   :  { %665 = vmatprep.subr.bf16.mxu1 %v905_v0  ;;  %681 = vmatprep.mubr.msk.bf16.mxu1 %vm906_vm0, %v905_v0  ;;  %v746_v6 = vld [vmem:[#allocation7 + $0x8] sm:$0xff]   ;;  %v740_v7 = vld [vmem:[#allocation5 + $0x20] sm:$0xff]   ;;  %v747_v8 = vld [vmem:[#allocation7 + $0x10] sm:$0xff]   ;;  %s557_s9 = sshll.u32 %s907_s8, 4  ;;  %s558_s9 = int_to_ptr.vmem [resolvable:$true] %s557_s9 }
  0x4c   :  { %646 = vmatpush3.bf16.msra.mxu0 %v736_v1  ;;  %666 = vmatpush3.bf16.msra.mxu1 %v745_v4  ;;  %v741_v9 = vld [vmem:[#allocation5 + $0x28] sm:$0xff]   ;;  %v748_v10 = vld [vmem:[#allocation7 + $0x18] sm:$0xff]   ;;  %v742_v11 = vld [vmem:[#allocation5 + $0x30] sm:$0xff]   ;;  %p874_p5 = scmp.lt.s32.totalorder %s558_s9, %s558_s9 }
  0x4d   :  { %647 = vmatprep.subr.bf16.mxu0 %v905_v0  ;;  %667 = vmatprep.subr.bf16.mxu1 %v905_v0  ;;  %v743_v12 = vld [vmem:[#allocation5 + $0x38] sm:$0xff]   ;;  %v749_v14 = vld [vmem:[#allocation7 + $0x20] sm:$0xff]   ;;  %v750_v15 = vld [vmem:[#allocation7 + $0x28] sm:$0xff]  }
  0x4e   :  { %v744_v13 = vld [vmem:[#allocation2] sm:$0xff]   ;;  %v751_v16 = vld [vmem:[#allocation7 + $0x30] sm:$0xff]   ;;  %v753_v18 = vld [vmem:[#allocation7 + $0x40] sm:$0xff]  }
  0x4f   :  { %v752_v17 = vld [vmem:[#allocation7 + $0x38] sm:$0xff]   ;;  %v754_v19 = vld [vmem:[#allocation7 + $0x48] sm:$0xff]   ;;  %v755_v20 = vld [vmem:[#allocation7 + $0x50] sm:$0xff]  }
  0x50   :  { %648 = vmatpush3.bf16.msra.mxu0 %v737_v2  ;;  %668 = vmatpush3.bf16.msra.mxu1 %v746_v6  ;;  %v756_v21 = vld [vmem:[#allocation7 + $0x58] sm:$0xff]   ;;  %v757_v32 = vld [vmem:[#allocation7 + $0x60] sm:$0xff]   ;;  %v758_v33 = vld [vmem:[#allocation7 + $0x68] sm:$0xff]  }
  0x51   :  { %649 = vmatprep.subr.bf16.mxu0 %v905_v0  ;;  %669 = vmatprep.subr.bf16.mxu1 %v905_v0  ;;  %v571_v22 = vld [vmem:[%s1090_s2] ss:$0 sm:$0xff]  ;;  %v759_v34 = vld [vmem:[#allocation7 + $0x70] sm:$0xff]   ;;  %v761_v36 = vld [vmem:[#allocation8] sm:$0xff]  }
  0x52   :  { %v760_v35 = vld [vmem:[#allocation7 + $0x78] sm:$0xff]   ;;  %v762_v37 = vld [vmem:[#allocation8 + $0x8] sm:$0xff]   ;;  %v763_v38 = vld [vmem:[#allocation8 + $0x10] sm:$0xff]  }
  0x53   :  { %v764_v39 = vld [vmem:[#allocation8 + $0x18] sm:$0xff]   ;;  %v765_v50 = vld [vmem:[#allocation8 + $0x20] sm:$0xff]   ;;  %v766_v51 = vld [vmem:[#allocation8 + $0x28] sm:$0xff]  }
  0x54   :  { %650 = vmatpush3.bf16.msra.mxu0 %v738_v3  ;;  %670 = vmatpush3.bf16.msra.mxu1 %v747_v8  ;;  %v581_v40 = vld [vmem:[%s1092_s4] ss:$0 sm:$0xff]  ;;  %v767_v52 = vld [vmem:[#allocation8 + $0x30] sm:$0xff]   ;;  %v591_v54 = vld [vmem:[%s1092_s4 + $0x1] ss:$0 sm:$0xff]  ;;  %s869_s4 = scalar_lea.vmem %s558_s9, 256 }
  0x55   :  { %651 = vmatprep.subr.bf16.mxu0 %v905_v0  ;;  %671 = vmatprep.subr.bf16.mxu1 %v905_v0  ;;  %v768_v53 = vld [vmem:[#allocation8 + $0x38] sm:$0xff]   ;;  %p870_p4 = scmp.ne.s32.totalorder %s558_s9, %s869_s4  ;;  %p875_p6 = scmp.lt.s32.totalorder %s869_s4, %s869_s4 }
  0x57   :  { %p876_p7 = por %p875_p6, %p874_p5 }
  0x58   :  { %652 = vmatpush3.bf16.msra.mxu0 %v739_v5  ;;  %672 = vmatpush3.bf16.msra.mxu1 %v748_v10 }
  0x59   :  { %653 = vmatprep.subr.bf16.mxu0 %v905_v0  ;;  %673 = vmatprep.subr.bf16.mxu1 %v905_v0  ;;  %p877_p8 = pnand %p876_p7, %p870_p4 }
  0x5c   :  { %654 = vmatpush3.bf16.msra.mxu0 %v740_v7  ;;  %674 = vmatpush3.bf16.msra.mxu1 %v749_v14 }
  0x5d   :  { %655 = vmatprep.subr.bf16.mxu0 %v905_v0  ;;  %675 = vmatprep.subr.bf16.mxu1 %v905_v0 }
  0x60   :  { %656 = vmatpush3.bf16.msra.mxu0 %v741_v9  ;;  %676 = vmatpush3.bf16.msra.mxu1 %v750_v15 }
  0x61   :  { %657 = vmatprep.subr.bf16.mxu0 %v905_v0  ;;  %677 = vmatprep.subr.bf16.mxu1 %v905_v0 }
  0x64   :  { %658 = vmatpush3.bf16.msra.mxu0 %v742_v11  ;;  %678 = vmatpush3.bf16.msra.mxu1 %v751_v16 }
  0x65   :  { %659 = vmatprep.subr.bf16.mxu0 %v905_v0  ;;  %679 = vmatprep.subr.bf16.mxu1 %v905_v0 }
  0x68   :  { %660 = vmatpush3.bf16.msra.mxu0 %v743_v12  ;;  %680 = vmatpush3.bf16.msra.mxu1 %v752_v17 }
  0x69   :  { %685 = vmatprep.subr.bf16.mxu0 %v905_v0  ;;  %705 = vmatprep.subr.bf16.mxu1 %v905_v0 }
  0x6b   :  { %662 = vmatmul.mubr.bf16.vlgmr.msra.gmra.mrb[0].mxu0 %v744_v13 }
  0x6c   :  { %701 = vmatprep.mubr.msk.bf16.mxu0 %vm906_vm0, %v905_v0  ;;  %686 = vmatpush3.bf16.msra.mxu0 %v753_v18 }
  0x6d   :  { %687 = vmatprep.subr.bf16.mxu0 %v905_v0 }
  0x70   :  { %688 = vmatpush3.bf16.msra.mxu0 %v754_v19 }
  0x71   :  { %689 = vmatprep.subr.bf16.mxu0 %v905_v0 }
  0x74   :  { %690 = vmatpush3.bf16.msra.mxu0 %v755_v20 }
  0x75   :  { %691 = vmatprep.subr.bf16.mxu0 %v905_v0 }
  0x78   :  { %692 = vmatpush3.bf16.msra.mxu0 %v756_v21 }
  0x79   :  { %693 = vmatprep.subr.bf16.mxu0 %v905_v0 }
  0x7c   :  { %694 = vmatpush3.bf16.msra.mxu0 %v757_v32 }
  0x7d   :  { %695 = vmatprep.subr.bf16.mxu0 %v905_v0 }
  0x80   :  { %696 = vmatpush3.bf16.msra.mxu0 %v758_v33 }
  0x81   :  { %697 = vmatprep.subr.bf16.mxu0 %v905_v0 }
  0x84   :  { %698 = vmatpush3.bf16.msra.mxu0 %v759_v34 }
  0x85   :  { %699 = vmatprep.subr.bf16.mxu0 %v905_v0 }
  0x88   :  { %700 = vmatpush3.bf16.msra.mxu0 %v760_v35 }
 0x13e   :  { %v196_v23 = vpop.f32.mrb[0].mxu0 }
 0x13f   :  { %v197_v24 = vadd.f32 %v571_v22, %v196_v23  ;;  %v663_v25 = vpop.f32.mrb[1].mxu0 }
 0x140   :  { %v199_v26 = vpop.f32.mrb[2].mxu0 }
 0x141   :  { %v200_v27 = vadd.f32 %v571_v22, %v199_v26  ;;  %v664_v28 = vpop.f32.mrb[3].mxu0  ;;  %769 = vtanh.f32 %v197_v24 }
 0x143   :  { %771 = vtanh.f32 %v200_v27 }
 0x14b   :  { %v770_v29 = vpop.eup %769 }
 0x14d   :  { %v772_v30 = vpop.eup %771 }
 0x14e   :  { %v205_v31 = vpack.c.bf16 %v772_v30, %v770_v29 }
 0x150   :  { %682 = vmatmul.mubr.bf16.vlgmr.msra.gmra.mrb[0].mxu1 %v205_v31 }
 0x151   :  { %721 = vmatprep.mubr.msk.bf16.mxu1 %vm906_vm0, %v905_v0  ;;  %706 = vmatpush3.bf16.msra.mxu1 %v761_v36 }
 0x152   :  { %707 = vmatprep.subr.bf16.mxu1 %v905_v0 }
 0x155   :  { %708 = vmatpush3.bf16.msra.mxu1 %v762_v37 }
 0x156   :  { %709 = vmatprep.subr.bf16.mxu1 %v905_v0 }
 0x159   :  { %710 = vmatpush3.bf16.msra.mxu1 %v763_v38 }
 0x15a   :  { %711 = vmatprep.subr.bf16.mxu1 %v905_v0 }
 0x15d   :  { %712 = vmatpush3.bf16.msra.mxu1 %v764_v39 }
 0x15e   :  { %713 = vmatprep.subr.bf16.mxu1 %v905_v0 }
 0x161   :  { %714 = vmatpush3.bf16.msra.mxu1 %v765_v50 }
 0x162   :  { %715 = vmatprep.subr.bf16.mxu1 %v905_v0 }
 0x165   :  { %716 = vmatpush3.bf16.msra.mxu1 %v766_v51 }
 0x166   :  { %717 = vmatprep.subr.bf16.mxu1 %v905_v0 }
 0x169   :  { %718 = vmatpush3.bf16.msra.mxu1 %v767_v52 }
 0x16a   :  { %719 = vmatprep.subr.bf16.mxu1 %v905_v0  ;;  %v600_v0 = vld [vmem:[%s1094_s6] ss:$0 sm:$0xff] }
 0x16d   :  { %720 = vmatpush3.bf16.msra.mxu1 %v768_v53 }
 0x223   :  { %v311_v41 = vpop.f32.mrb[0].mxu1 }
 0x224   :  { %v312_v42 = vadd.f32 %v581_v40, %v311_v41  ;;  %v683_v43 = vpop.f32.mrb[1].mxu1 }
 0x225   :  { %v314_v44 = vpop.f32.mrb[2].mxu1 }
 0x226   :  { %v315_v45 = vadd.f32 %v581_v40, %v314_v44  ;;  %v684_v46 = vpop.f32.mrb[3].mxu1  ;;  %773 = vtanh.f32 %v312_v42 }
 0x228   :  { %775 = vtanh.f32 %v315_v45 }
 0x230   :  { %v774_v47 = vpop.eup %773 }
 0x232   :  { %v776_v48 = vpop.eup %775 }
 0x233   :  { %v320_v49 = vpack.c.bf16 %v776_v48, %v774_v47 }
 0x235   :  { %702 = vmatmul.mubr.bf16.vlgmr.msra.gmra.mrb[4].mxu0 %v320_v49 }
 0x308   :  { %v428_v55 = vpop.f32.mrb[4].mxu0 }
 0x309   :  { %v429_v56 = vadd.f32 %v591_v54, %v428_v55  ;;  %v703_v57 = vpop.f32.mrb[5].mxu0 }
 0x30a   :  { %v431_v58 = vpop.f32.mrb[6].mxu0 }
 0x30b   :  { %v432_v59 = vadd.f32 %v591_v54, %v431_v58  ;;  %v704_v60 = vpop.f32.mrb[7].mxu0  ;;  %777 = vtanh.f32 %v429_v56 }
 0x30d   :  { %779 = vtanh.f32 %v432_v59 }
 0x315   :  { %v778_v61 = vpop.eup %777 }
 0x317   :  { %v780_v62 = vpop.eup %779 }
 0x318   :  { %v437_v63 = vpack.c.bf16 %v780_v62, %v778_v61 }
 0x31a   :  { %722 = vmatmul.mubr.bf16.vlgmr.msra.gmra.mrb[4].mxu1 %v437_v63 }
 0x3ed   :  { %v543_v1 = vpop.f32.mrb[4].mxu1 }
 0x3ee   :  { %v544_v2 = vadd.f32 %v600_v0, %v543_v1  ;;  %v723_v3 = vpop.f32.mrb[5].mxu1 }
 0x3ef   :  { %v546_v4 = vpop.f32.mrb[6].mxu1 }
 0x3f0   :  { %550 = vst [vmem:[#allocation10] sm:$0xff] %v544_v2  ;;  %v547_v5 = vadd.f32 %v600_v0, %v546_v4  ;;  %v724_v6 = vpop.f32.mrb[7].mxu1 }
 0x3f2   :  { %551 = vst [vmem:[#allocation10 + $0x8] sm:$0xff] %v547_v5 }
 0x3f3   :  { %880 = shalt.err (!%p877_p8)
}
 0x3f4   :  { %s881_s11 = scalar_lea.hbm %s1095_s7, 256 }
 0x3f5   :  { %p882_p9 = scmp.ne.s32.totalorder %s1095_s7, %s881_s11  ;;  %p885_p10 = scmp.lt.u32.totalorder %s881_s11, %s1095_s7 }
 0x3f7   :  { %p887_p11 = pnand %p885_p10, %p882_p9 }
 0x3f9   :  { %890 = shalt.err (!%p887_p11)
}
 0x3fa   :  { %s908_s27 = smov 128   ;;  %s909_s17 = smov 8  }
 0x3fb   :  { %563 = dma.vmem_to_hbm [thread:$0]  %s558_s9, 256, %s1095_s7, [#allocation4], %s908_s27, %s908_s27, %s909_s17  }
 0x3fc   :  { %897 = dma.done.wait [#allocation4], 256  }
 0x3fd   :  { %898 = vsyncadd [#allocation4], 4294967040 }
 0x3fe   :  { %567 = vsyncpa [#allocation3], 1 }
 0x3ff   :  { %568 = vsyncpa [#allocation6], 1 }
 0x400   :  { %569 = vsyncpa [#allocation9], 1 }
 0x401   :  { %570 = vsyncpa [#allocation4], 1 }

</bundles_post_ra>
